<compile_context>
chip_gen: v5e
topology: v5e:2x2
jax: 0.10.0
libtpu: 0.0.40
codegen_flags: <defaults>
</compile_context>

<pallas_src>
import math
from functools import partial

import jax
import jax.numpy as jnp
from jax.experimental import pallas as pl
from jax.experimental.pallas import tpu as pltpu

_LANE = 128
_MIB = 1024 * 1024


def _add_pe_kernel(x_ref, pe_ref, o_ref):
    # x_ref: (tb, tc) tile of flattened (B, S*D) activations.
    # pe_ref: (1, tc) tile of the flattened positional table, broadcast over rows.
    o_ref[...] = x_ref[...] + pe_ref[...]


def make_sinusoidal_pe(dims: int, max_len: int, dtype=jnp.float32) -> jnp.ndarray:
    """__init__-time construction of the PE buffer, shape (1, max_len, dims), in the
    model dtype (so the kernel's pe DMA is half-width for bf16 models)."""
    position = jnp.arange(0, max_len, dtype=jnp.float32)[:, None]            # (L, 1)
    div_term = jnp.exp(
        jnp.arange(0, dims, 2, dtype=jnp.float32) * -(math.log(10000.0) / dims)
    )                                                                         # (D/2,)
    angles = position * div_term                                              # (L, D/2)
    pe = jnp.zeros((max_len, dims), dtype=jnp.float32)
    pe = pe.at[:, 0::2].set(jnp.sin(angles))
    pe = pe.at[:, 1::2].set(jnp.cos(angles))
    return pe[None].astype(dtype)                                             # (1, L, D)


def _round_up(v: int, m: int) -> int:
    return -(-v // m) * m


def _vmem_capacity_bytes() -> int:
    try:
        return int(pltpu.get_tpu_info().vmem_capacity_bytes)
    except Exception:
        return 64 * _MIB  # assume the most restrictive generation (v7x)


def _choose_tiles(b: int, n: int, itemsize: int,
                  target_tile_bytes: int, vmem_budget_bytes: int):
    """Byte-targeted tile selection for the flattened (B, S*D) array.

    1. Prefer tc == n (full row): one contiguous HBM slab per block, long unmasked
       stores, smallest grid. Size tb so the block lands near target_tile_bytes.
    2. Only if a full-row tile cannot fit the double-buffered VMEM budget, tile the
       column axis in 128-lane multiples (Pallas masks the partial boundary block).
    """
    sub = max(8, 32 // itemsize)  # sublane packing: 8 (f32), 16 (bf16), 32 (i8)

    def vmem_bytes(tb, tc):
        tile = _round_up(tb, sub) * _round_up(tc, _LANE) * itemsize
        pe_tile = sub * _round_up(tc, _LANE) * itemsize  # 1-row tile pads to `sub` rows
        return 2 * tile + 2 * tile + 2 * pe_tile         # x, out, pe double buffers

    # --- 1) full-row column tile ---
    tc = n
    row_bytes = _round_up(tc, _LANE) * itemsize
    tb = min(b, max(1, target_tile_bytes // row_bytes))
    if tb < b:
        tb = min(b, max(sub, (tb // sub) * sub))  # sublane-aligned, or full B
    if vmem_bytes(tb, tc) <= vmem_budget_bytes:
        return tb, tc

    # Shrink rows (keeping sublane alignment) before giving up on full-row tiles.
    while tb > sub and vmem_bytes(tb, tc) > vmem_budget_bytes:
        tb = max(sub, ((tb // 2) // sub) * sub)
    if vmem_bytes(tb, tc) <= vmem_budget_bytes:
        return tb, tc

    # --- 2) column-tile in 128-lane multiples (strided DMA, masked boundary block) ---
    tb = min(b, sub)
    tc = max(_LANE,
             (target_tile_bytes // (_round_up(tb, sub) * itemsize)) // _LANE * _LANE)
    while tc > _LANE and vmem_bytes(tb, tc) > vmem_budget_bytes:
        tc = max(_LANE, ((tc // 2) // _LANE) * _LANE)
    return tb, tc


@partial(jax.jit, static_argnames=("target_tile_bytes", "in_place"))
def sinusoidal_positional_encoding(x, pe, *, target_tile_bytes: int = 4 * _MIB,
                                   in_place: bool = False):
    """forward: x + pe[:, :x.shape[1]] with x of shape (B, S, D)."""
    b, s, d = x.shape
    n = s * d

    # Lane-dense layout: flatten (S, D) -> S*D (contiguous reshape, free). The batch
    # broadcast is preserved: one pe row is shared by every batch row.
    x2 = x.reshape(b, n)
    pe2 = pe[:, :s, :].reshape(1, n)
    if pe2.dtype != x.dtype:
        pe2 = pe2.astype(x.dtype)  # no-op when pe was built in the model dtype at init

    itemsize = jnp.dtype(x.dtype).itemsize
    vmem_budget = (_vmem_capacity_bytes() * 3) // 4   # 48 MiB v7x, 96 MiB v5e/v6e
    tb, tc = _choose_tiles(b, n, itemsize, target_tile_bytes, vmem_budget)

    # Column axis OUTER, batch axis INNER: the pe block index (0, j) is unchanged
    # across consecutive batch iterations, so the pe tile stays VMEM-resident.
    grid = (pl.cdiv(n, tc), pl.cdiv(b, tb))

    cost = pl.CostEstimate(
        flops=b * n,
        transcendentals=0,
        bytes_accessed=(2 * b * n + n) * itemsize,  # read x, write out, read pe once
    )

    out2 = pl.pallas_call(
        _add_pe_kernel,
        out_shape=jax.ShapeDtypeStruct((b, n), x.dtype),
        grid_spec=pltpu.PrefetchScalarGridSpec(
            num_scalar_prefetch=0,
            grid=grid,
            in_specs=[
                pl.BlockSpec((tb, tc), lambda j, i: (i, j)),   # x tile
                pl.BlockSpec((1, tc), lambda j, i: (0, j)),    # pe tile (batch-invariant)
            ],
            out_specs=pl.BlockSpec((tb, tc), lambda j, i: (i, j)),
        ),
        compiler_params=pltpu.CompilerParams(
            # Column axis sharded across TensorCores on v7x (no-op on v5e/v6e).
            dimension_semantics=("parallel", "parallel"),
            vmem_limit_bytes=int(vmem_budget),
        ),
        cost_estimate=cost,
        input_output_aliases=({0: 0} if in_place else {}),
    )(x2, pe2)

    return out2.reshape(b, s, d)


if __name__ == "__main__":
    # Small, module-consistent shapes: batch=2, seq=8, dims=32, max_len=64.
    B, S, D, MAX_LEN = 2, 8, 32, 64
    key = jax.random.PRNGKey(0)
    x = jax.random.normal(key, (B, S, D), dtype=jnp.float32)
    pe = make_sinusoidal_pe(D, MAX_LEN, dtype=x.dtype)

    out = jax.block_until_ready(sinusoidal_positional_encoding(x, pe))
    ref = x + pe[:, :S, :]
    assert out.shape == (B, S, D)
    assert jnp.allclose(out, ref, atol=1e-6, rtol=1e-6)

    # Second check: dims NOT (8, 128)-aligned (B=3, S=7, D=20 -> n=140) exercises the
    # full-extent-block / cdiv-grid path that previously fell back to a fragile shape.
    B2, S2, D2, MAX2 = 3, 7, 20, 16
    x_b = jax.random.normal(jax.random.PRNGKey(0), (B2, S2, D2), dtype=jnp.float32)
    pe_b = make_sinusoidal_pe(D2, MAX2, dtype=x_b.dtype)
    out_b = jax.block_until_ready(sinusoidal_positional_encoding(x_b, pe_b))
    ref_b = x_b + pe_b[:, :S2, :]
    assert jnp.allclose(out_b, ref_b, atol=1e-6, rtol=1e-6)

    print("KERNEL_OK")
</pallas_src>

<mosaic_0001>
module attributes {stable_mosaic.version = 11 : i64} {
  func.func @_add_pe_kernel(%arg0: i32, %arg1: i32, %arg2: memref<2x256xf32, #tpu.memory_space<vmem>>, %arg3: memref<1x256xf32, #tpu.memory_space<vmem>>, %arg4: memref<2x256xf32, #tpu.memory_space<vmem>>) attributes {dimension_semantics = [#tpu.dimension_semantics<parallel>, #tpu.dimension_semantics<parallel>], iteration_bounds = array<i64: 1, 1>, scalar_prefetch = 0 : i64, scratch_operands = 0 : i64, tpu.core_type = #tpu.core_type<tc>, window_params = [{transform_indices = @transform_0, window_bounds = array<i64: 2, 256>}, {transform_indices = @transform_1, window_bounds = array<i64: 1, 256>}, {transform_indices = @transform_2, window_bounds = array<i64: 2, 256>}]} {
    %c0 = arith.constant 0 : index
    %c0_0 = arith.constant 0 : index
    %0 = vector.load %arg2[%c0, %c0_0] : memref<2x256xf32, #tpu.memory_space<vmem>>, vector<2x256xf32>
    %c0_1 = arith.constant 0 : index
    %c0_2 = arith.constant 0 : index
    %1 = vector.load %arg3[%c0_1, %c0_2] : memref<1x256xf32, #tpu.memory_space<vmem>>, vector<1x256xf32>
    %2 = vector.broadcast %1 : vector<1x256xf32> to vector<2x256xf32>
    %3 = arith.addf %0, %2 : vector<2x256xf32>
    %c0_3 = arith.constant 0 : index
    %c0_4 = arith.constant 0 : index
    %4 = vector.load %arg4[%c0_3, %c0_4] : memref<2x256xf32, #tpu.memory_space<vmem>>, vector<2x256xf32>
    tpu.vector_store %arg4[%c0_3, %c0_4], %3 {strides = array<i32>} : memref<2x256xf32, #tpu.memory_space<vmem>>, vector<2x256xf32>,
    return
  }
  func.func @transform_0(%arg0: i32, %arg1: i32) -> (i32, i32) {
    %c0_i32 = arith.constant 0 : i32
    return %arg1, %arg0 : i32, i32
  }
  func.func @transform_1(%arg0: i32, %arg1: i32) -> (i32, i32) {
    %c0_i32 = arith.constant 0 : i32
    %c0_i32_0 = arith.constant 0 : i32
    return %c0_i32, %arg0 : i32, i32
  }
  func.func @transform_2(%arg0: i32, %arg1: i32) -> (i32, i32) {
    %c0_i32 = arith.constant 0 : i32
    return %arg1, %arg0 : i32, i32
  }
}

</mosaic_0001>

<bundles_post_ra>
// kernel: sinusoidal_positional_encoding.1
= control target key start
LH: loop header
LB: loop body
LE: loop exit
PB: predicated region body
PF: predicated region fallthrough
CT: control target
= control target key end

     0   :  { %vm17_vm0 = vcmask 1041408   ;;  %s50_s1 = inlined_call_operand.vmem [shape: f32[1,256], index: 1, kind: input, shape index: {}]   ;;  %s51_s0 = inlined_call_operand.vmem [shape: f32[2,256], index: 0, kind: input, shape index: {}]   ;;  %s52_s2 = inlined_call_operand.vmem [shape: f32[2,256], index: 2, kind: output, shape index: {}]  }
   0x1   :  { %v12_v0 = vld [vmem:[%s50_s1] sm:$0x3] }
   0x2   :  { %v14_v1 = vperm.slane %v12_v0, 0  ;;  %v15_v2 = vperm.slane %v12_v0, 1  ;;  %v11_v3 = vld [vmem:[%s51_s0] sm:$0xf] }
   0x4   :  { %v16_v4 = vrot.slane %v15_v2, 6 }
   0x6   :  { %v18_v5 = vsel %vm17_vm0, %v14_v1, %v16_v4 }
   0x7   :  { %v20_v6 = vadd.f32 %v18_v5, %v11_v3 }
   0x9   :  { %21 = vst [vmem:[%s52_s2] sm:$0xf] %v20_v6 }

</bundles_post_ra>
